<compile_context>
chip_gen: v7x
topology: tpu7x:2x2x1
jax: 0.10.0
libtpu: 0.0.40
codegen_flags: <defaults>
</compile_context>

<pallas_src>
import functools

import jax
import jax.numpy as jnp
from jax.experimental import pallas as pl
from jax.experimental.pallas import tpu as pltpu


# ------------------------------- kernels -------------------------------------


def _flip_rows_kernel(sel_ref, x_ref, o_ref):
    # sel_ref: (f,) int32 SMEM -- selected row indices; only the index maps use it.
    # x_ref / o_ref: (1, TL) VMEM -- one lane-chunk of one selected row.
    del sel_ref
    o_ref[...] = -x_ref[...]


def _dense_sign_kernel(sign_ref, x_ref, o_ref):
    # sign_ref: (TM, 1) per-row +/-1 already in the data dtype; x/o: (TM, TN).
    o_ref[...] = x_ref[...] * sign_ref[...]


# ------------------------------- helpers --------------------------------------


def _lane_block(seq_len, itemsize, max_block_bytes):
    """Largest multiple of 128 dividing seq_len, capped at max_block_bytes.

    Falls back to the full row when seq_len is not 128-aligned (a full-extent
    block is always legal; a ragged tail chunk would force masked stores).
    """
    max_elems = max(128, int(max_block_bytes) // int(itemsize))
    if seq_len % 128 != 0 or seq_len <= max_elems:
        return seq_len
    best = 128
    cand = 256
    while cand <= max_elems:
        if seq_len % cand == 0:
            best = cand
        cand += 128
    return best


def _flip_sparse(data, selection, *, f, max_block_bytes):
    """Negate only the f selected rows (gather/scatter via scalar prefetch)."""
    n_ts, seq_len = data.shape
    itemsize = jnp.dtype(data.dtype).itemsize
    tl = _lane_block(seq_len, itemsize, max_block_bytes)
    n_chunks = seq_len // tl

    def row_map(i, j, sel):  # data-dependent row gather / scatter
        return (sel[i], j)

    in_spec_kwargs = {}
    if f * n_chunks >= 3:
        # Keep several small row-chunk DMAs in flight; this path is latency-bound.
        in_spec_kwargs["pipeline_mode"] = pl.Buffered(3)

    return pl.pallas_call(
        _flip_rows_kernel,
        out_shape=jax.ShapeDtypeStruct((n_ts, seq_len), data.dtype),
        grid_spec=pltpu.PrefetchScalarGridSpec(
            num_scalar_prefetch=1,                 # selection -> SMEM
            grid=(f, n_chunks),
            in_specs=[pl.BlockSpec((1, tl), row_map, **in_spec_kwargs)],
            out_specs=pl.BlockSpec((1, tl), row_map),
        ),
        # In-place scatter: `data` is call-arg 1 (after the prefetch operand);
        # untouched rows keep their input values.  This is hazard-free only
        # because `selection` holds distinct rows (replace=False / single row).
        input_output_aliases={1: 0},
        compiler_params=pltpu.CompilerParams(
            dimension_semantics=("parallel", "parallel"),
        ),
        cost_estimate=pl.CostEstimate(
            flops=f * seq_len,
            transcendentals=0,
            bytes_accessed=2 * f * seq_len * itemsize,
        ),
    )(selection, data)


def _flip_dense(data, selection, *, max_block_bytes):
    """Full-tile path for large f: multiply every row by a +/-1 per-row sign."""
    n_ts, seq_len = data.shape
    dtype = data.dtype
    itemsize = jnp.dtype(dtype).itemsize

    # Per-row sign column, prebuilt in the data dtype (no in-kernel convert).
    signs = jnp.ones((n_ts,), dtype).at[selection].set(-1.0)[:, None]

    tn = _lane_block(seq_len, itemsize, max_block_bytes)
    tm = n_ts if (n_ts % 8 != 0 or n_ts <= 512) else 512

    return pl.pallas_call(
        _dense_sign_kernel,
        out_shape=jax.ShapeDtypeStruct((n_ts, seq_len), dtype),
        grid=(pl.cdiv(n_ts, tm), pl.cdiv(seq_len, tn)),
        in_specs=[
            pl.BlockSpec((tm, 1), lambda i, j: (i, 0)),
            pl.BlockSpec((tm, tn), lambda i, j: (i, j)),
        ],
        out_specs=pl.BlockSpec((tm, tn), lambda i, j: (i, j)),
        input_output_aliases={1: 0},
        compiler_params=pltpu.CompilerParams(
            dimension_semantics=("parallel", "parallel"),
        ),
        cost_estimate=pl.CostEstimate(
            flops=n_ts * seq_len,
            transcendentals=0,
            bytes_accessed=2 * n_ts * seq_len * itemsize,
        ),
    )(signs, data)


# ------------------------------- wrapper --------------------------------------


def random_amplitude_flip(data, key, p=0.5, f=1, max_block_bytes=128 * 1024):
    """JAX/Pallas equivalent of RandomAmplitudeFlip.forward.

    data: (n_ts, seq_len) array.
    key:  jax.random key driving the coin flip and the row selection.
    p, f, max_block_bytes must be static under jit.
    """
    n_ts, _ = data.shape
    k_coin, k_sel = jax.random.split(key)

    if f == 1:
        # Avoid choice(replace=False)'s full permutation just to pick one row.
        selection = jax.random.randint(k_sel, (1,), 0, n_ts, dtype=jnp.int32)
    else:
        # TODO(synk): replace=False materializes an O(n_ts log n_ts) permutation;
        # for huge n_ts and small f a cheaper distinct-draw scheme would win.
        selection = jax.random.choice(
            k_sel, n_ts, shape=(f,), replace=False).astype(jnp.int32)

    # Dense full-tile path once single-row (single-sublane) DMAs (~1/8 HBM
    # bandwidth for f32, ~1/16 for bf16) would lose to just touching everything.
    rows_per_sublane_tile = max(1, 32 // jnp.dtype(data.dtype).itemsize)
    if f * rows_per_sublane_tile >= n_ts:
        flip_fn = functools.partial(_flip_dense, max_block_bytes=max_block_bytes)
    else:
        flip_fn = functools.partial(_flip_sparse, f=f,
                                    max_block_bytes=max_block_bytes)

    if p <= 0.0:            # static: never flips -> no kernel at all
        return data
    if p >= 1.0:            # static: always flips -> no cond needed
        return flip_fn(data, selection)

    do_flip = jax.random.uniform(k_coin, ()) < p
    # The no-flip branch now skips the kernel launch and all row DMAs entirely.
    return jax.lax.cond(
        do_flip,
        lambda d, s: flip_fn(d, s),
        lambda d, s: d,
        data, selection,
    )


# --------------------------------- tests --------------------------------------

if __name__ == "__main__":
    key = jax.random.PRNGKey(0)
    k_data, k1, k2, k3, k4 = jax.random.split(key, 5)

    flip = jax.jit(random_amplitude_flip,
                   static_argnames=("p", "f", "max_block_bytes"))

    # --- test 1: module defaults (p=0.5, f=1), sparse path under lax.cond -----
    data = jax.random.normal(k_data, (8, 128), dtype=jnp.float32)
    out = jax.block_until_ready(flip(data, k1, p=0.5, f=1))
    neg = jnp.all(out == -data, axis=1)
    same = jnp.all(out == data, axis=1)
    assert bool(jnp.all(neg | same))
    assert int(jnp.sum(neg & ~same)) <= 1

    # --- test 2: p=1.0, f=3, n_ts=16 -> dense full-tile fallback --------------
    data2 = jax.random.normal(k_data, (16, 256), dtype=jnp.float32)
    out2 = jax.block_until_ready(flip(data2, k2, p=1.0, f=3))
    neg2 = jnp.all(out2 == -data2, axis=1)
    same2 = jnp.all(out2 == data2, axis=1)
    assert bool(jnp.all(neg2 | same2))
    assert int(jnp.sum(neg2 & ~same2)) == 3

    # --- test 3: p=0.0 must return the data bit-exactly (no kernel launched) --
    out3 = jax.block_until_ready(flip(data2, k2, p=0.0, f=3))
    assert bool(jnp.array_equal(out3, data2))

    # --- test 4: sparse path with lane-chunking + Buffered(3) (grid=(2,2)) ----
    data4 = jax.random.normal(k_data, (32, 256), dtype=jnp.float32)
    out4 = jax.block_until_ready(flip(data4, k3, p=1.0, f=2, max_block_bytes=512))
    neg4 = jnp.all(out4 == -data4, axis=1)
    same4 = jnp.all(out4 == data4, axis=1)
    assert bool(jnp.all(neg4 | same4))
    assert int(jnp.sum(neg4 & ~same4)) == 2

    # --- test 5: sparse kernel taken through the lax.cond branch --------------
    out5 = jax.block_until_ready(flip(data4, k4, p=0.999, f=2))
    neg5 = jnp.all(out5 == -data4, axis=1)
    same5 = jnp.all(out5 == data4, axis=1)
    assert bool(jnp.all(neg5 | same5))
    assert int(jnp.sum(neg5 & ~same5)) in (0, 2)

    print("KERNEL_OK")
</pallas_src>

<mosaic_0001>
module attributes {stable_mosaic.version = 11 : i64} {
  func.func @_dense_sign_kernel(%arg0: i32, %arg1: i32, %arg2: memref<8x1xf32, #tpu.memory_space<vmem>>, %arg3: memref<8x128xf32, #tpu.memory_space<vmem>>, %arg4: memref<8x128xf32, #tpu.memory_space<vmem>>) attributes {dimension_semantics = [#tpu.dimension_semantics<parallel>, #tpu.dimension_semantics<parallel>], iteration_bounds = array<i64: 1, 1>, scalar_prefetch = 0 : i64, scratch_operands = 0 : i64, tpu.core_type = #tpu.core_type<tc>, window_params = [{transform_indices = @transform_0, window_bounds = array<i64: 8, 1>}, {transform_indices = @transform_1, window_bounds = array<i64: 8, 128>}, {transform_indices = @transform_2, window_bounds = array<i64: 8, 128>}]} {
    %c0 = arith.constant 0 : index
    %c0_0 = arith.constant 0 : index
    %0 = vector.load %arg3[%c0, %c0_0] : memref<8x128xf32, #tpu.memory_space<vmem>>, vector<8x128xf32>
    %c0_1 = arith.constant 0 : index
    %c0_2 = arith.constant 0 : index
    %1 = vector.load %arg2[%c0_1, %c0_2] : memref<8x1xf32, #tpu.memory_space<vmem>>, vector<8x1xf32>
    %2 = vector.broadcast %1 : vector<8x1xf32> to vector<8x128xf32>
    %3 = arith.mulf %0, %2 : vector<8x128xf32>
    %c0_3 = arith.constant 0 : index
    %c0_4 = arith.constant 0 : index
    %4 = vector.load %arg4[%c0_3, %c0_4] : memref<8x128xf32, #tpu.memory_space<vmem>>, vector<8x128xf32>
    tpu.vector_store %arg4[%c0_3, %c0_4], %3 {strides = array<i32>} : memref<8x128xf32, #tpu.memory_space<vmem>>, vector<8x128xf32>,
    return
  }
  func.func @transform_0(%arg0: i32, %arg1: i32) -> (i32, i32) {
    %c0_i32 = arith.constant 0 : i32
    %c0_i32_0 = arith.constant 0 : i32
    return %arg0, %c0_i32 : i32, i32
  }
  func.func @transform_1(%arg0: i32, %arg1: i32) -> (i32, i32) {
    %c0_i32 = arith.constant 0 : i32
    return %arg0, %arg1 : i32, i32
  }
  func.func @transform_2(%arg0: i32, %arg1: i32) -> (i32, i32) {
    %c0_i32 = arith.constant 0 : i32
    return %arg0, %arg1 : i32, i32
  }
}

</mosaic_0001>

<bundles_post_ra>
// kernel: branch_1_fun.2
= control target key start
LH: loop header
LB: loop body
LE: loop exit
PB: predicated region body
PF: predicated region fallthrough
CT: control target
= control target key end

     0   :  { %v26_v0 = vmov 0   ;;  %s51_s0 = inlined_call_operand.vmem [shape: f32[8,1], index: 0, kind: input, shape index: {}]   ;;  %s52_s1 = inlined_call_operand.vmem [shape: f32[8,128], index: 1, kind: input, shape index: {}, may-alias: {1,2}]   ;;  %s53_s2 = inlined_call_operand.vmem [shape: f32[8,128], index: 2, kind: output, shape index: {}, may-alias: {1,2}]  }
   0x1   :  { %25 = vset.pattern.permute.xlu0 %v26_v0  ;;  %v12_v1 = vld [vmem:[%s51_s0] sm:$0xff] }
   0x2   :  { %15 = vperm.xlu0 %25, %v12_v1   ;;  %v11_v2 = vld [vmem:[%s52_s1] sm:$0xff] }
  0x81   :  { %v16_v3 = vpop.permute.xlu0 %15 }
  0x82   :  { %v18_v4 = vmul.f32 %v16_v3, %v11_v2 }
  0x84   :  { %19 = vst [vmem:[%s53_s2] sm:$0xff] %v18_v4 }

</bundles_post_ra>
